<compile_context>
chip_gen: v5e
topology: v5e:2x2
jax: 0.10.0
libtpu: 0.0.40
codegen_flags: <defaults>
</compile_context>

<pallas_src>
import functools

import jax
import jax.numpy as jnp
from jax.experimental import pallas as pl
from jax.experimental.pallas import tpu as pltpu

_LANE = 128


def _round_up(n, m):
    return ((n + m - 1) // m) * m


def _pad_axis(x, target, axis):
    pad = target - x.shape[axis]
    if pad == 0:
        return x
    widths = [(0, 0)] * x.ndim
    widths[axis] = (0, pad)
    return jnp.pad(x, widths)


def _decoder_kernel(z_ref, w1_ref, b1_ref, w2_ref, b2_ref, w3_ref, b3_ref,
                    o_ref):
    # bf16 operands into the MXU, f32 accumulation; bias add + ReLU on the VPU.
    z = z_ref[...].astype(jnp.bfloat16)

    h = jnp.dot(z, w1_ref[...], preferred_element_type=jnp.float32)
    h = jnp.maximum(h + b1_ref[...], 0.0)          # ReLU (Dropout p=0 -> id)

    h = jnp.dot(h.astype(jnp.bfloat16), w2_ref[...],
                preferred_element_type=jnp.float32)
    h = jnp.maximum(h + b2_ref[...], 0.0)          # ReLU (Dropout p=0 -> id)

    y = jnp.dot(h.astype(jnp.bfloat16), w3_ref[...],
                preferred_element_type=jnp.float32)
    o_ref[...] = (y + b3_ref[...]).astype(o_ref.dtype)


@functools.partial(jax.jit, static_argnames=("out_dim", "block_b"))
def vae_decoder_fcl(z, kernel_params, *, out_dim, block_b=128):
    """z: [B, latent_dim] -> [B, out_dim].

    kernel_params come from `prepare_params` (lane-padded, bf16 weights).
    """
    w1, b1, w2, b2, w3, b3 = kernel_params
    B, _ = z.shape
    Lp, H2p = w1.shape
    H1p = w2.shape[1]
    Op = w3.shape[1]

    # Pad batch to a multiple of the tile and latent dim to the padded K.
    Bp = _round_up(max(B, 1), block_b)
    z_p = _pad_axis(_pad_axis(z, Bp, 0), Lp, 1)

    grid = (Bp // block_b,)

    # Weights / biases: whole-array VMEM residency (single copy, not pipelined).
    vmem = pl.BlockSpec(memory_space=pltpu.MemorySpace.VMEM)

    flops = 2 * Bp * (Lp * H2p + H2p * H1p + H1p * Op)
    bytes_accessed = (
        z_p.size * z_p.dtype.itemsize
        + sum(a.size * a.dtype.itemsize for a in (w1, b1, w2, b2, w3, b3))
        + Bp * Op * z.dtype.itemsize)

    out = pl.pallas_call(
        _decoder_kernel,
        out_shape=jax.ShapeDtypeStruct((Bp, Op), z.dtype),
        grid_spec=pltpu.PrefetchScalarGridSpec(
            num_scalar_prefetch=0,
            grid=grid,
            in_specs=[
                pl.BlockSpec((block_b, Lp), lambda i: (i, 0)),  # z (pipelined)
                vmem,   # w1
                vmem,   # b1
                vmem,   # w2
                vmem,   # b2
                vmem,   # w3
                vmem,   # b3
            ],
            out_specs=pl.BlockSpec((block_b, Op), lambda i: (i, 0)),
        ),
        compiler_params=pltpu.CompilerParams(
            dimension_semantics=("parallel",)),
        cost_estimate=pl.CostEstimate(
            flops=flops, transcendentals=0, bytes_accessed=bytes_accessed),
    )(z_p, w1, b1, w2, b2, w3, b3)

    return out[:B, :out_dim]


def init_params(key, latent_dim, hidden_dim_2, hidden_dim_1, output_dim):
    """PyTorch-style init: U(-1/sqrt(fan_in), 1/sqrt(fan_in)).

    Returns f32 weights already transposed to [in, out] layout and (1, out)
    biases (the 'module parameters')."""
    def linear(k, fan_in, fan_out):
        kw, kb = jax.random.split(k)
        bound = 1.0 / jnp.sqrt(fan_in)
        w = jax.random.uniform(kw, (fan_out, fan_in), jnp.float32,
                               -bound, bound).T          # [in, out]
        b = jax.random.uniform(kb, (1, fan_out), jnp.float32, -bound, bound)
        return w, b

    k1, k2, k3 = jax.random.split(key, 3)
    w1, b1 = linear(k1, latent_dim, hidden_dim_2)
    w2, b2 = linear(k2, hidden_dim_2, hidden_dim_1)
    w3, b3 = linear(k3, hidden_dim_1, output_dim)
    return (w1, b1, w2, b2, w3, b3)


def prepare_params(params, lane=_LANE):
    """Pad all feature dims to multiples of 128 (lane-dense) and cast weights
    to bf16 for the MXU. Biases stay f32 (added post-accumulation)."""
    w1, b1, w2, b2, w3, b3 = params
    L, H2 = w1.shape
    H1 = w2.shape[1]
    O = w3.shape[1]
    Lp, H2p, H1p, Op = (_round_up(d, lane) for d in (L, H2, H1, O))

    w1p = _pad_axis(_pad_axis(w1, Lp, 0), H2p, 1).astype(jnp.bfloat16)
    w2p = _pad_axis(_pad_axis(w2, H2p, 0), H1p, 1).astype(jnp.bfloat16)
    w3p = _pad_axis(_pad_axis(w3, H1p, 0), Op, 1).astype(jnp.bfloat16)
    b1p = _pad_axis(b1, H2p, 1).astype(jnp.float32)
    b2p = _pad_axis(b2, H1p, 1).astype(jnp.float32)
    b3p = _pad_axis(b3, Op, 1).astype(jnp.float32)
    return (w1p, b1p, w2p, b2p, w3p, b3p)


def reference_forward_f32(z, params):
    """Pure f32 reference (matches the PyTorch fp32 module)."""
    w1, b1, w2, b2, w3, b3 = params
    h = jax.nn.relu(z @ w1 + b1)
    h = jax.nn.relu(h @ w2 + b2)
    return h @ w3 + b3


def reference_forward_mxu(z, params):
    """Reference emulating the kernel's precision policy
    (bf16 operands, f32 accumulation, f32 bias add)."""
    w1, b1, w2, b2, w3, b3 = params
    bf = jnp.bfloat16
    h = jax.nn.relu(jnp.dot(z.astype(bf), w1.astype(bf),
                            preferred_element_type=jnp.float32) + b1)
    h = jax.nn.relu(jnp.dot(h.astype(bf), w2.astype(bf),
                            preferred_element_type=jnp.float32) + b2)
    return jnp.dot(h.astype(bf), w3.astype(bf),
                   preferred_element_type=jnp.float32) + b3


if __name__ == "__main__":
    # Small shapes consistent with the module's constructor; batch chosen so
    # the grid has 2 parallel steps with the 128-row default tile.
    batch = 256
    latent_dim = 16
    hidden_dim_2 = 32
    hidden_dim_1 = 64
    output_dim = 128

    key = jax.random.PRNGKey(0)
    kz, kp = jax.random.split(key)

    z = jax.random.normal(kz, (batch, latent_dim), jnp.float32)
    params = init_params(kp, latent_dim, hidden_dim_2, hidden_dim_1,
                         output_dim)
    kparams = prepare_params(params)

    out = vae_decoder_fcl(z, kparams, out_dim=output_dim, block_b=128)
    out = jax.block_until_ready(out)
    assert out.shape == (batch, output_dim), out.shape

    # Tight check vs. a reference with the same bf16-in / f32-acc policy.
    ref_mxu = reference_forward_mxu(z, params)
    assert jnp.allclose(out, ref_mxu, atol=2e-3, rtol=2e-3), \
        "mismatch vs bf16/f32 reference"

    # Looser check vs. the pure-f32 PyTorch-equivalent reference (bf16 operand
    # rounding is the only difference).
    ref_f32 = reference_forward_f32(z, params)
    assert jnp.allclose(out, ref_f32, atol=5e-2, rtol=5e-2), \
        "mismatch vs f32 reference"

    print("KERNEL_OK")
</pallas_src>

<mosaic_0001>
module attributes {stable_mosaic.version = 11 : i64} {
  func.func @_decoder_kernel(%arg0: i32, %arg1: memref<128x128xf32, #tpu.memory_space<vmem>>, %arg2: memref<128x128xbf16, #tpu.memory_space<vmem>>, %arg3: memref<1x128xf32, #tpu.memory_space<vmem>>, %arg4: memref<128x128xbf16, #tpu.memory_space<vmem>>, %arg5: memref<1x128xf32, #tpu.memory_space<vmem>>, %arg6: memref<128x128xbf16, #tpu.memory_space<vmem>>, %arg7: memref<1x128xf32, #tpu.memory_space<vmem>>, %arg8: memref<128x128xf32, #tpu.memory_space<vmem>>) attributes {dimension_semantics = [#tpu.dimension_semantics<parallel>], iteration_bounds = array<i64: 2>, scalar_prefetch = 0 : i64, scratch_operands = 0 : i64, tpu.core_type = #tpu.core_type<tc>, window_params = [{transform_indices = @transform_0, window_bounds = array<i64: 128, 128>}, {pipeline_mode = #tpu.pipeline_mode<synchronous>, transform_indices = @transform_1, window_bounds = array<i64: 128, 128>}, {pipeline_mode = #tpu.pipeline_mode<synchronous>, transform_indices = @transform_2, window_bounds = array<i64: 1, 128>}, {pipeline_mode = #tpu.pipeline_mode<synchronous>, transform_indices = @transform_3, window_bounds = array<i64: 128, 128>}, {pipeline_mode = #tpu.pipeline_mode<synchronous>, transform_indices = @transform_4, window_bounds = array<i64: 1, 128>}, {pipeline_mode = #tpu.pipeline_mode<synchronous>, transform_indices = @transform_5, window_bounds = array<i64: 128, 128>}, {pipeline_mode = #tpu.pipeline_mode<synchronous>, transform_indices = @transform_6, window_bounds = array<i64: 1, 128>}, {transform_indices = @transform_7, window_bounds = array<i64: 128, 128>}]} {
    %c0 = arith.constant 0 : index
    %c0_0 = arith.constant 0 : index
    %0 = vector.load %arg1[%c0, %c0_0] : memref<128x128xf32, #tpu.memory_space<vmem>>, vector<128x128xf32>
    %1 = arith.truncf %0 : vector<128x128xf32> to vector<128x128xbf16>
    %c0_1 = arith.constant 0 : index
    %c0_2 = arith.constant 0 : index
    %2 = vector.load %arg2[%c0_1, %c0_2] : memref<128x128xbf16, #tpu.memory_space<vmem>>, vector<128x128xbf16>
    %cst = arith.constant dense<0.000000e+00> : vector<128x128xf32>
    %3 = tpu.matmul %1, %2, %cst {dimension_numbers = #tpu.dot_dimension_numbers<[1], [0], [0], [1], [0, 0, 1, 1], [], []>} : vector<128x128xbf16>, vector<128x128xbf16>, vector<128x128xf32> -> vector<128x128xf32>
    %c0_3 = arith.constant 0 : index
    %c0_4 = arith.constant 0 : index
    %4 = vector.load %arg3[%c0_3, %c0_4] : memref<1x128xf32, #tpu.memory_space<vmem>>, vector<1x128xf32>
    %5 = vector.broadcast %4 : vector<1x128xf32> to vector<128x128xf32>
    %6 = arith.addf %3, %5 : vector<128x128xf32>
    %cst_5 = arith.constant 0.000000e+00 : f32
    %7 = vector.broadcast %cst_5 : f32 to vector<128x128xf32>
    %8 = arith.maximumf %6, %7 : vector<128x128xf32>
    %9 = arith.truncf %8 : vector<128x128xf32> to vector<128x128xbf16>
    %c0_6 = arith.constant 0 : index
    %c0_7 = arith.constant 0 : index
    %10 = vector.load %arg4[%c0_6, %c0_7] : memref<128x128xbf16, #tpu.memory_space<vmem>>, vector<128x128xbf16>
    %cst_8 = arith.constant dense<0.000000e+00> : vector<128x128xf32>
    %11 = tpu.matmul %9, %10, %cst_8 {dimension_numbers = #tpu.dot_dimension_numbers<[1], [0], [0], [1], [0, 0, 1, 1], [], []>} : vector<128x128xbf16>, vector<128x128xbf16>, vector<128x128xf32> -> vector<128x128xf32>
    %c0_9 = arith.constant 0 : index
    %c0_10 = arith.constant 0 : index
    %12 = vector.load %arg5[%c0_9, %c0_10] : memref<1x128xf32, #tpu.memory_space<vmem>>, vector<1x128xf32>
    %13 = vector.broadcast %12 : vector<1x128xf32> to vector<128x128xf32>
    %14 = arith.addf %11, %13 : vector<128x128xf32>
    %cst_11 = arith.constant 0.000000e+00 : f32
    %15 = vector.broadcast %cst_11 : f32 to vector<128x128xf32>
    %16 = arith.maximumf %14, %15 : vector<128x128xf32>
    %17 = arith.truncf %16 : vector<128x128xf32> to vector<128x128xbf16>
    %c0_12 = arith.constant 0 : index
    %c0_13 = arith.constant 0 : index
    %18 = vector.load %arg6[%c0_12, %c0_13] : memref<128x128xbf16, #tpu.memory_space<vmem>>, vector<128x128xbf16>
    %cst_14 = arith.constant dense<0.000000e+00> : vector<128x128xf32>
    %19 = tpu.matmul %17, %18, %cst_14 {dimension_numbers = #tpu.dot_dimension_numbers<[1], [0], [0], [1], [0, 0, 1, 1], [], []>} : vector<128x128xbf16>, vector<128x128xbf16>, vector<128x128xf32> -> vector<128x128xf32>
    %c0_15 = arith.constant 0 : index
    %c0_16 = arith.constant 0 : index
    %20 = vector.load %arg7[%c0_15, %c0_16] : memref<1x128xf32, #tpu.memory_space<vmem>>, vector<1x128xf32>
    %21 = vector.broadcast %20 : vector<1x128xf32> to vector<128x128xf32>
    %22 = arith.addf %19, %21 : vector<128x128xf32>
    %c0_17 = arith.constant 0 : index
    %c0_18 = arith.constant 0 : index
    %23 = vector.load %arg8[%c0_17, %c0_18] : memref<128x128xf32, #tpu.memory_space<vmem>>, vector<128x128xf32>
    tpu.vector_store %arg8[%c0_17, %c0_18], %22 {strides = array<i32>} : memref<128x128xf32, #tpu.memory_space<vmem>>, vector<128x128xf32>,
    return
  }
  func.func @transform_0(%arg0: i32) -> (i32, i32) {
    %c0_i32 = arith.constant 0 : i32
    %c0_i32_0 = arith.constant 0 : i32
    return %arg0, %c0_i32 : i32, i32
  }
  func.func @transform_1(%arg0: i32) -> (i32, i32) {
    %c0_i32 = arith.constant 0 : i32
    %c0_i32_0 = arith.constant 0 : i32
    %c0_i32_1 = arith.constant 0 : i32
    return %c0_i32, %c0_i32_0 : i32, i32
  }
  func.func @transform_2(%arg0: i32) -> (i32, i32) {
    %c0_i32 = arith.constant 0 : i32
    %c0_i32_0 = arith.constant 0 : i32
    %c0_i32_1 = arith.constant 0 : i32
    return %c0_i32, %c0_i32_0 : i32, i32
  }
  func.func @transform_3(%arg0: i32) -> (i32, i32) {
    %c0_i32 = arith.constant 0 : i32
    %c0_i32_0 = arith.constant 0 : i32
    %c0_i32_1 = arith.constant 0 : i32
    return %c0_i32, %c0_i32_0 : i32, i32
  }
  func.func @transform_4(%arg0: i32) -> (i32, i32) {
    %c0_i32 = arith.constant 0 : i32
    %c0_i32_0 = arith.constant 0 : i32
    %c0_i32_1 = arith.constant 0 : i32
    return %c0_i32, %c0_i32_0 : i32, i32
  }
  func.func @transform_5(%arg0: i32) -> (i32, i32) {
    %c0_i32 = arith.constant 0 : i32
    %c0_i32_0 = arith.constant 0 : i32
    %c0_i32_1 = arith.constant 0 : i32
    return %c0_i32, %c0_i32_0 : i32, i32
  }
  func.func @transform_6(%arg0: i32) -> (i32, i32) {
    %c0_i32 = arith.constant 0 : i32
    %c0_i32_0 = arith.constant 0 : i32
    %c0_i32_1 = arith.constant 0 : i32
    return %c0_i32, %c0_i32_0 : i32, i32
  }
  func.func @transform_7(%arg0: i32) -> (i32, i32) {
    %c0_i32 = arith.constant 0 : i32
    %c0_i32_0 = arith.constant 0 : i32
    return %arg0, %c0_i32 : i32, i32
  }
}

</mosaic_0001>

<bundles_post_ra>
// kernel: vae_decoder_fcl.1
= control target key start
LH: loop header
LB: loop body
LE: loop exit
PB: predicated region body
PF: predicated region fallthrough
CT: control target
= control target key end

     0   :  { %12 = vsyncpa [#allocation3], 0  ;;  %s1328_s0 = inlined_call_operand.vmem [shape: f32[256,128], index: 0, kind: input, shape index: {}]   ;;  %s1329_s1 = inlined_call_operand.vmem [shape: bf16[128,128], index: 1, kind: input, shape index: {}]   ;;  %s1330_s2 = inlined_call_operand.vmem [shape: f32[1,128], index: 2, kind: input, shape index: {}]   ;;  %s1331_s3 = inlined_call_operand.vmem [shape: bf16[128,128], index: 3, kind: input, shape index: {}]   ;;  %s1332_s4 = inlined_call_operand.vmem [shape: f32[1,128], index: 4, kind: input, shape index: {}]   ;;  %s1333_s5 = inlined_call_operand.vmem [shape: bf16[128,128], index: 5, kind: input, shape index: {}]   ;;  %s1334_s6 = inlined_call_operand.vmem [shape: f32[1,128], index: 6, kind: input, shape index: {}]   ;;  %s1335_s7 = inlined_call_operand.hbm [shape: f32[256,128], index: 7, kind: output, shape index: {}]  }
   0x1   :  { %14 = vsyncpa [#allocation3 + $0x1], 0  ;;  %s1104_s24 = smov 0   ;;  %s1106_s25 = smov 0  }
   0x2   :  { %s1108_s26 = smov 0   ;;  %s1110_s27 = smov 0  }
   0x3 LB: > { %s1125_s28 = sadd.s32 4294967295, %s1060_s27   ;;  %s797_s29 = sadd.s32 4294967294, %s1060_s27   ;;  %s1060_s27 = sphi %s1110_s27, %s1341_s27   ;;  %s1056_s26 = sphi %s1108_s26, %s1340_s26   ;;  %s1052_s25 = sphi %s1106_s25, %s1339_s25   ;;  %s1048_s24 = sphi %s1104_s24, %s1338_s24  }
   0x4   : > { %s1129_s30 = sadd.s32 1, %s1060_s27   ;;  %s179_s8 = sadd.s32 1, %s1056_s26 }
   0x5   : > { %s176_s9 = ssub.s32 %s1060_s27, %s1129_s30  ;;  %p189_p0 = scmp.ne.s32.totalorder %s1056_s26, %s1052_s25 }
   0x6   : > { %p177_p1 = scmp.eq.s32.totalorder %s176_s9, 0  ;;  %p190_p2 = scmp.eq.s32.totalorder %s1125_s28, 1 }
   0x7   : > { %p195_p3 = scmp.ne.s32.totalorder %s1052_s25, %s1048_s24  ;;  %p196_p4 = scmp.eq.s32.totalorder %s797_s29, 1 }
   0x8   : > { %s1140_s10 = scalar_select %p177_p1, %s1056_s26, %s179_s8  }
   0x9   : > { %p1142_p5 = por %p190_p2, %p189_p0  ;;  %p1146_p6 = por %p196_p4, %p195_p3 }
   0xa   : > { %p800_p7 = scmp.ge.s32.totalorder %s1060_s27, 1  ;;  %p241_p8 = scmp.lt.s32.totalorder %s1060_s27, 3 }
   0xc   : > { %p242_p9 = pnand %p800_p7, %p241_p8 }
   0xd   : > { %s802_s19 = sshll.u32 (!%p242_p9), %s1125_s28, 4  ;;  %s270_s14 = sand.u32 (!%p242_p9), 1, %s1052_s25  }
   0xe   : > { %245 = sbr.rel (%p242_p9) target bundleno = 557 (0x22d), region = 48  ;;  %p274_p10 = scmp.lt.s32.totalorder (!%p242_p9), %s802_s19, 31 }
   0xf   : > { %s801_s15 = sshll.u32 (!%p242_p9), %s270_s14, 7  ;;  %s720_s8 = scalar_lea.sflag (!%p242_p9), [#allocation3], %s270_s14 }
  0x10   : > { %s1276_s20 = scalar_lea.vmem (!%p242_p9), [#allocation2], %s801_s15  ;;  %s1018_s16 = scalar_lea.hbm (!%p242_p9), %s1335_s7, 256 }
  0x11   : > { %s732_s23 = sshll.u32 (!%p242_p9), %s1276_s20, 4  ;;  %s733_s23 = int_to_ptr.vmem [resolvable:$true] %s732_s23 }
  0x13   : > { %v912_v0 = vld [vmem:[%s1329_s1 + $0x38] sm:$0xff]  ;;  %v911_v1 = vld [vmem:[%s1329_s1 + $0x30] sm:$0xff]  ;;  %v910_v2 = vld [vmem:[%s1329_s1 + $0x28] sm:$0xff]  ;;  %s1343_s19 = smov (!%p274_p10, %s802_s19), 31 }
  0x14   : > { %372 = vmatpush.bf16.msra.mxu0 %v912_v0  ;;  %930 = vmatpush.bf16.msra.mxu3 %v912_v0  ;;  %v909_v3 = vld [vmem:[%s1329_s1 + $0x20] sm:$0xff]  ;;  %v908_v4 = vld [vmem:[%s1329_s1 + $0x18] sm:$0xff]  ;;  %v907_v5 = vld [vmem:[%s1329_s1 + $0x10] sm:$0xff]  ;;  %s803_s9 = sshll.u32 %s1343_s19, 3  ;;  %s929_s19 = sshll.u32 %s1125_s28, 7 }
  0x15   : > { %v906_v6 = vld [vmem:[%s1329_s1 + $0x8] sm:$0xff]  ;;  %s1177_s17 = scalar_lea.vmem %s1328_s0, %s803_s9  ;;  %v905_v7 = vld [vmem:[%s1329_s1] sm:$0xff]  ;;  %v920_v26 = vld [vmem:[%s1331_s3 + $0x38] sm:$0xff]  ;;  %s731_s22 = scalar_lea.hbm %s1335_s7, %s929_s19 }
  0x16   : > { %v280_v8 = vld [vmem:[%s1177_s17] sm:$0xff]  ;;  %v281_v9 = vld [vmem:[%s1177_s17 + $0x8] sm:$0xff]  ;;  %v282_v14 = vld [vmem:[%s1177_s17 + $0x10] sm:$0xff]  ;;  %513 = vmatpush.bf16.msra.mxu1 %v920_v26  ;;  %s734_s29 = sshll.u32 %s731_s22, 4  ;;  %s735_s29 = int_to_ptr.hbm [resolvable:$true] %s734_s29 }
  0x17   : > { %v292_v10 = vld [vmem:[%s1177_s17 + $0x60] sm:$0xff]  ;;  %v293_v11 = vld [vmem:[%s1177_s17 + $0x68] sm:$0xff]  ;;  %v296_v12 = vpack.c.bf16 %v281_v9, %v280_v8  ;;  %v283_v15 = vld [vmem:[%s1177_s17 + $0x18] sm:$0xff]  ;;  %s1012_s9 = sshra.s32 %s735_s29, 4  ;;  %s1013_s9 = int_to_ptr.hbm [resolvable:$true] %s1012_s9 }
  0x18   : > { %373 = vmatpush.bf16.msra.mxu0 %v911_v1  ;;  %931 = vmatpush.bf16.msra.mxu3 %v911_v1  ;;  %v302_v13 = vpack.c.bf16 %v293_v11, %v292_v10  ;;  %v294_v16 = vld [vmem:[%s1177_s17 + $0x70] sm:$0xff]  ;;  %v295_v17 = vld [vmem:[%s1177_s17 + $0x78] sm:$0xff]  ;;  %v297_v18 = vpack.c.bf16 %v283_v15, %v282_v14  ;;  %v284_v20 = vld [vmem:[%s1177_s17 + $0x20] sm:$0xff]  ;;  %s1014_s28 = scalar_lea.hbm %s1013_s9, 128  ;;  %p1019_p0 = scmp.lt.s32.totalorder %s1013_s9, %s1335_s7 }
  0x19   : > { %v303_v19 = vpack.c.bf16 %v295_v17, %v294_v16  ;;  %v285_v21 = vld [vmem:[%s1177_s17 + $0x28] sm:$0xff]  ;;  %v286_v23 = vld [vmem:[%s1177_s17 + $0x30] sm:$0xff]  ;;  %v287_v24 = vld [vmem:[%s1177_s17 + $0x38] sm:$0xff]  ;;  %p1015_p11 = scmp.ne.s32.totalorder %s1013_s9, %s1014_s28  ;;  %p1020_p1 = scmp.lt.s32.totalorder %s1018_s16, %s1014_s28 }
  0x1a   : > { %v298_v22 = vpack.c.bf16 %v285_v21, %v284_v20  ;;  %v299_v25 = vpack.c.bf16 %v287_v24, %v286_v23  ;;  %v919_v27 = vld [vmem:[%s1331_s3 + $0x30] sm:$0xff]  ;;  %v918_v28 = vld [vmem:[%s1331_s3 + $0x28] sm:$0xff]  ;;  %v288_v29 = vld [vmem:[%s1177_s17 + $0x40] sm:$0xff] }
  0x1b   : > { %514 = vmatpush.bf16.msra.mxu1 %v919_v27  ;;  %v289_v30 = vld [vmem:[%s1177_s17 + $0x48] sm:$0xff]  ;;  %v917_v31 = vld [vmem:[%s1331_s3 + $0x20] sm:$0xff]  ;;  %v290_v33 = vld [vmem:[%s1177_s17 + $0x50] sm:$0xff]  ;;  %p1016_p12 = pnand %p1015_p11, %p1142_p5  ;;  %p1021_p2 = por %p1020_p1, %p1019_p0 }
  0x1c   : > { %374 = vmatpush.bf16.msra.mxu0 %v910_v2  ;;  %932 = vmatpush.bf16.msra.mxu3 %v910_v2  ;;  %v300_v32 = vpack.c.bf16 %v289_v30, %v288_v29  ;;  %v291_v34 = vld [vmem:[%s1177_s17 + $0x58] sm:$0xff]  ;;  %v915_v37 = vld [vmem:[%s1331_s3 + $0x10] sm:$0xff]  ;;  %v914_v38 = vld [vmem:[%s1331_s3 + $0x8] sm:$0xff] }
  0x1d   : > { %v301_v35 = vpack.c.bf16 %v291_v34, %v290_v33  ;;  %v916_v36 = vld [vmem:[%s1331_s3 + $0x18] sm:$0xff]  ;;  %v913_v39 = vld [vmem:[%s1331_s3] sm:$0xff]  ;;  %v927_v21 = vld [vmem:[%s1333_s5 + $0x30] sm:$0xff]  ;;  %p1017_p13 = pneg %p1016_p12 }
  0x1e   : > { %v1225_v41 = vld [vmem:[%s1330_s2] ss:$0 sm:$0xff] }
  0x1f   : > { %515 = vmatpush.bf16.msra.mxu1 %v918_v28  ;;  %p1022_p3 = pnand %p1021_p2, %p1017_p13 }
  0x20   : > { %375 = vmatpush.bf16.msra.mxu0 %v909_v3  ;;  %933 = vmatpush.bf16.msra.mxu3 %v909_v3 }
  0x23   : > { %516 = vmatpush.bf16.msra.mxu1 %v917_v31 }
  0x24   : > { %376 = vmatpush.bf16.msra.mxu0 %v908_v4  ;;  %934 = vmatpush.bf16.msra.mxu3 %v908_v4 }
  0x27   : > { %517 = vmatpush.bf16.msra.mxu1 %v916_v36 }
  0x28   : > { %377 = vmatpush.bf16.msra.mxu0 %v907_v5  ;;  %935 = vmatpush.bf16.msra.mxu3 %v907_v5 }
  0x2b   : > { %518 = vmatpush.bf16.msra.mxu1 %v915_v37 }
  0x2c   : > { %378 = vmatpush.bf16.msra.mxu0 %v906_v6  ;;  %936 = vmatpush.bf16.msra.mxu3 %v906_v6 }
  0x2f   : > { %519 = vmatpush.bf16.msra.mxu1 %v914_v38 }
  0x30   : > { %379 = vmatpush.bf16.msra.mxu0 %v905_v7  ;;  %937 = vmatpush.bf16.msra.mxu3 %v905_v7 }
  0x33   : > { %380 = vmatmul.bf16.vlgmr.msra.gmra.mxu0 %v296_v12  ;;  %410 = vmatmul.bf16.vlgmr.msra.gmra.mxu3 %v302_v13 }
  0x34   : > { %938 = vmatpush.bf16.msrb.mxu3 %v920_v26  ;;  %520 = vmatpush.bf16.msra.mxu1 %v913_v39  ;;  %v925_v26 = vld [vmem:[%s1333_s5 + $0x20] sm:$0xff] }
  0x38   : > { %939 = vmatpush.bf16.msrb.mxu3 %v919_v27 }
  0x3c   : > { %940 = vmatpush.bf16.msrb.mxu3 %v918_v28 }
  0x40   : > { %941 = vmatpush.bf16.msrb.mxu3 %v917_v31 }
  0x43   : > { %385 = vmatmul.bf16.gmra.mxu0 %v297_v18  ;;  %415 = vmatmul.bf16.gmra.mxu3 %v303_v19  ;;  %v928_v19 = vld [vmem:[%s1333_s5 + $0x38] sm:$0xff] }
  0x44   : > { %942 = vmatpush.bf16.msrb.mxu3 %v916_v36  ;;  %654 = vmatpush.bf16.msra.mxu2 %v928_v19 }
  0x48   : > { %943 = vmatpush.bf16.msrb.mxu3 %v915_v37  ;;  %655 = vmatpush.bf16.msra.mxu2 %v927_v21  ;;  %v924_v37 = vld [vmem:[%s1333_s5 + $0x18] sm:$0xff] }
  0x4c   : > { %944 = vmatpush.bf16.msrb.mxu3 %v914_v38  ;;  %v923_v38 = vld [vmem:[%s1333_s5 + $0x10] sm:$0xff] }
  0x50   : > { %945 = vmatpush.bf16.msrb.mxu3 %v913_v39  ;;  %v922_v39 = vld [vmem:[%s1333_s5 + $0x8] sm:$0xff] }
  0x53   : > { %390 = vmatmul.bf16.gmra.mxu0 %v298_v22  ;;  %v926_v22 = vld [vmem:[%s1333_s5 + $0x28] sm:$0xff] }
  0x54   : > { %946 = vmatpush.bf16.msra.mxu3 %v928_v19  ;;  %656 = vmatpush.bf16.msra.mxu2 %v926_v22 }
  0x58   : > { %947 = vmatpush.bf16.msra.mxu3 %v927_v21  ;;  %657 = vmatpush.bf16.msra.mxu2 %v925_v26 }
  0x5c   : > { %948 = vmatpush.bf16.msra.mxu3 %v926_v22  ;;  %658 = vmatpush.bf16.msra.mxu2 %v924_v37 }
  0x60   : > { %949 = vmatpush.bf16.msra.mxu3 %v925_v26  ;;  %659 = vmatpush.bf16.msra.mxu2 %v923_v38 }
  0x63   : > { %395 = vmatmul.bf16.gmra.mxu0 %v299_v25 }
  0x64   : > { %950 = vmatpush.bf16.msra.mxu3 %v924_v37  ;;  %660 = vmatpush.bf16.msra.mxu2 %v922_v39 }
  0x68   : > { %951 = vmatpush.bf16.msra.mxu3 %v923_v38 }
  0x6c   : > { %952 = vmatpush.bf16.msra.mxu3 %v922_v39 }
  0x73   : > { %400 = vmatmul.bf16.gmra.mxu0 %v300_v32 }
  0x83   : > { %405 = vmatmul.bf16.gmra.mxu0 %v301_v35 }
  0xb0   : > { %v381_v40 = vpop.f32.mrf.mxu0 }
  0xb1   : > { %v382_v43 = vadd.f32 %v1225_v41, %v381_v40  ;;  %v921_v40 = vld [vmem:[%s1333_s5] sm:$0xff] }
  0xb2   : > { %661 = vmatpush.bf16.msra.mxu2 %v921_v40  ;;  %953 = vmatpush.bf16.msra.mxu3 %v921_v40 }
  0xb3   : > { %v421_v46 = vmax.f32 %v382_v43, 0.0 }
  0xb6   : > { %v411_v42 = vpop.f32.mrf.mxu3 }
  0xb7   : > { %v412_v48 = vadd.f32 %v1225_v41, %v411_v42  ;;  %v996_v42 = vld [vmem:[%s1332_s4] ss:$0 sm:$0xff] }
  0xb8   : > { %v383_v44 = vpop.f32.mrf.mxu0 }
  0xb9   : > { %v384_v45 = vadd.f32 %v1225_v41, %v383_v44  ;;  %v433_v51 = vmax.f32 %v412_v48, 0.0 }
  0xbb   : > { %v422_v47 = vmax.f32 %v384_v45, 0.0 }
  0xbd   : > { %v437_v49 = vpack.c.bf16 %v422_v47, %v421_v46 }
  0xbe   : > { %v413_v50 = vpop.f32.mrf.mxu3 }
  0xbf   : > { %521 = vmatmul.bf16.vlgmr.msra.gmra.mxu1 %v437_v49  ;;  %v414_v52 = vadd.f32 %v1225_v41, %v413_v50 }
  0xc0   : > { %v386_v53 = vpop.f32.mrf.mxu0 }
  0xc1   : > { %v434_v54 = vmax.f32 %v414_v52, 0.0  ;;  %v387_v57 = vadd.f32 %v1225_v41, %v386_v53 }
  0xc3   : > { %v443_v55 = vpack.c.bf16 %v434_v54, %v433_v51  ;;  %v423_v60 = vmax.f32 %v387_v57, 0.0 }
  0xc5   : > { %551 = vmatmul.bf16.vlgmr.msrb.gmra.mxu3 %v443_v55 }
  0xc6   : > { %v416_v56 = vpop.f32.mrf.mxu3 }
  0xc7   : > { %v417_v62 = vadd.f32 %v1225_v41, %v416_v56 }
  0xc8   : > { %v388_v58 = vpop.f32.mrf.mxu0 }
  0xc9   : > { %v389_v59 = vadd.f32 %v1225_v41, %v388_v58  ;;  %v435_v1 = vmax.f32 %v417_v62, 0.0 }
  0xcb   : > { %v424_v61 = vmax.f32 %v389_v59, 0.0 }
  0xcd   : > { %v438_v63 = vpack.c.bf16 %v424_v61, %v423_v60 }
  0xce   : > { %v418_v0 = vpop.f32.mrf.mxu3 }
  0xcf   : > { %526 = vmatmul.bf16.gmra.mxu1 %v438_v63  ;;  %v419_v2 = vadd.f32 %v1225_v41, %v418_v0 }
  0xd0   : > { %v391_v3 = vpop.f32.mrf.mxu0 }
  0xd1   : > { %v436_v4 = vmax.f32 %v419_v2, 0.0  ;;  %v392_v6 = vadd.f32 %v1225_v41, %v391_v3 }
  0xd3   : > { %v444_v5 = vpack.c.bf16 %v436_v4, %v435_v1  ;;  %v425_v9 = vmax.f32 %v392_v6, 0.0 }
  0xd5   : > { %556 = vmatmul.bf16.gmra.mxu3 %v444_v5 }
  0xd8   : > { %v393_v7 = vpop.f32.mrf.mxu0 }
  0xd9   : > { %v394_v8 = vadd.f32 %v1225_v41, %v393_v7 }
  0xdb   : > { %v426_v10 = vmax.f32 %v394_v8, 0.0 }
  0xdd   : > { %v439_v11 = vpack.c.bf16 %v426_v10, %v425_v9 }
  0xdf   : > { %531 = vmatmul.bf16.gmra.mxu1 %v439_v11 }
  0xe0   : > { %v396_v12 = vpop.f32.mrf.mxu0 }
  0xe1   : > { %v397_v13 = vadd.f32 %v1225_v41, %v396_v12 }
  0xe3   : > { %v427_v16 = vmax.f32 %v397_v13, 0.0 }
  0xe8   : > { %v398_v14 = vpop.f32.mrf.mxu0 }
  0xe9   : > { %v399_v15 = vadd.f32 %v1225_v41, %v398_v14 }
  0xeb   : > { %v428_v17 = vmax.f32 %v399_v15, 0.0 }
  0xed   : > { %v440_v18 = vpack.c.bf16 %v428_v17, %v427_v16 }
  0xef   : > { %536 = vmatmul.bf16.gmra.mxu1 %v440_v18 }
  0xf0   : > { %v401_v20 = vpop.f32.mrf.mxu0 }
  0xf1   : > { %v402_v23 = vadd.f32 %v1225_v41, %v401_v20 }
  0xf3   : > { %v429_v27 = vmax.f32 %v402_v23, 0.0 }
  0xf8   : > { %v403_v24 = vpop.f32.mrf.mxu0 }
  0xf9   : > { %v404_v25 = vadd.f32 %v1225_v41, %v403_v24 }
  0xfb   : > { %v430_v28 = vmax.f32 %v404_v25, 0.0 }
  0xfd   : > { %v441_v29 = vpack.c.bf16 %v430_v28, %v429_v27 }
  0xff   : > { %541 = vmatmul.bf16.gmra.mxu1 %v441_v29 }
 0x100   : > { %v406_v30 = vpop.f32.mrf.mxu0 }
 0x101   : > { %v407_v31 = vadd.f32 %v1225_v41, %v406_v30 }
 0x103   : > { %v431_v34 = vmax.f32 %v407_v31, 0.0 }
 0x108   : > { %v408_v32 = vpop.f32.mrf.mxu0 }
 0x109   : > { %v409_v33 = vadd.f32 %v1225_v41, %v408_v32 }
 0x10b   : > { %v432_v35 = vmax.f32 %v409_v33, 0.0 }
 0x10d   : > { %v442_v36 = vpack.c.bf16 %v432_v35, %v431_v34  ;;  %v997_v34 = vld [vmem:[%s1334_s6] ss:$0 sm:$0xff] }
 0x10f   : > { %546 = vmatmul.bf16.gmra.mxu1 %v442_v36 }
 0x13c   : > { %v522_v41 = vpop.f32.mrf.mxu1 }
 0x13d   : > { %v523_v43 = vadd.f32 %v996_v42, %v522_v41 }
 0x13f   : > { %v562_v46 = vmax.f32 %v523_v43, 0.0 }
 0x144   : > { %v524_v44 = vpop.f32.mrf.mxu1 }
 0x145   : > { %v525_v45 = vadd.f32 %v996_v42, %v524_v44 }
 0x147   : > { %v563_v47 = vmax.f32 %v525_v45, 0.0 }
 0x148   : > { %v552_v48 = vpop.f32.mrf.mxu3 }
 0x149   : > { %v578_v49 = vpack.c.bf16 %v563_v47, %v562_v46  ;;  %v553_v51 = vadd.f32 %v996_v42, %v552_v48 }
 0x14b   : > { %662 = vmatmul.bf16.vlgmr.msra.gmra.mxu2 %v578_v49  ;;  %v574_v53 = vmax.f32 %v553_v51, 0.0 }
 0x14c   : > { %v527_v50 = vpop.f32.mrf.mxu1 }
 0x14d   : > { %v528_v55 = vadd.f32 %v996_v42, %v527_v50 }
 0x14f   : > { %v564_v60 = vmax.f32 %v528_v55, 0.0 }
 0x150   : > { %v554_v52 = vpop.f32.mrf.mxu3 }
 0x151   : > { %v555_v54 = vadd.f32 %v996_v42, %v554_v52 }
 0x153   : > { %v575_v56 = vmax.f32 %v555_v54, 0.0 }
 0x154   : > { %v529_v57 = vpop.f32.mrf.mxu1 }
 0x155   : > { %v530_v58 = vadd.f32 %v996_v42, %v529_v57  ;;  %v584_v59 = vpack.c.bf16 %v575_v56, %v574_v53 }
 0x157   : > { %v565_v61 = vmax.f32 %v530_v58, 0.0  ;;  %692 = vmatmul.bf16.vlgmr.msra.gmra.mxu3 %v584_v59 }
 0x158   : > { %v557_v62 = vpop.f32.mrf.mxu3 }
 0x159   : > { %v579_v63 = vpack.c.bf16 %v565_v61, %v564_v60  ;;  %v558_v1 = vadd.f32 %v996_v42, %v557_v62 }
 0x15b   : > { %667 = vmatmul.bf16.gmra.mxu2 %v579_v63  ;;  %v576_v3 = vmax.f32 %v558_v1, 0.0 }
 0x15c   : > { %v532_v0 = vpop.f32.mrf.mxu1 }
 0x15d   : > { %v533_v5 = vadd.f32 %v996_v42, %v532_v0 }
 0x15f   : > { %v566_v10 = vmax.f32 %v533_v5, 0.0 }
 0x160   : > { %v559_v2 = vpop.f32.mrf.mxu3 }
 0x161   : > { %v560_v4 = vadd.f32 %v996_v42, %v559_v2 }
 0x163   : > { %v577_v6 = vmax.f32 %v560_v4, 0.0 }
 0x164   : > { %v534_v7 = vpop.f32.mrf.mxu1 }
 0x165   : > { %v535_v8 = vadd.f32 %v996_v42, %v534_v7  ;;  %v585_v9 = vpack.c.bf16 %v577_v6, %v576_v3 }
 0x167   : > { %v567_v11 = vmax.f32 %v535_v8, 0.0  ;;  %697 = vmatmul.bf16.gmra.mxu3 %v585_v9 }
 0x169   : > { %v580_v12 = vpack.c.bf16 %v567_v11, %v566_v10 }
 0x16b   : > { %672 = vmatmul.bf16.gmra.mxu2 %v580_v12 }
 0x16c   : > { %v537_v13 = vpop.f32.mrf.mxu1 }
 0x16d   : > { %v538_v14 = vadd.f32 %v996_v42, %v537_v13 }
 0x16f   : > { %v568_v17 = vmax.f32 %v538_v14, 0.0 }
 0x174   : > { %v539_v15 = vpop.f32.mrf.mxu1 }
 0x175   : > { %v540_v16 = vadd.f32 %v996_v42, %v539_v15 }
 0x177   : > { %v569_v18 = vmax.f32 %v540_v16, 0.0 }
 0x179   : > { %v581_v19 = vpack.c.bf16 %v569_v18, %v568_v17 }
 0x17b   : > { %677 = vmatmul.bf16.gmra.mxu2 %v581_v19 }
 0x17c   : > { %v542_v20 = vpop.f32.mrf.mxu1 }
 0x17d   : > { %v543_v21 = vadd.f32 %v996_v42, %v542_v20 }
 0x17f   : > { %v570_v24 = vmax.f32 %v543_v21, 0.0 }
 0x184   : > { %v544_v22 = vpop.f32.mrf.mxu1 }
 0x185   : > { %v545_v23 = vadd.f32 %v996_v42, %v544_v22 }
 0x187   : > { %v571_v25 = vmax.f32 %v545_v23, 0.0 }
 0x189   : > { %v582_v26 = vpack.c.bf16 %v571_v25, %v570_v24 }
 0x18b   : > { %682 = vmatmul.bf16.gmra.mxu2 %v582_v26 }
 0x18c   : > { %v547_v27 = vpop.f32.mrf.mxu1 }
 0x18d   : > { %v548_v28 = vadd.f32 %v996_v42, %v547_v27 }
 0x18f   : > { %v572_v31 = vmax.f32 %v548_v28, 0.0 }
 0x194   : > { %v549_v29 = vpop.f32.mrf.mxu1 }
 0x195   : > { %v550_v30 = vadd.f32 %v996_v42, %v549_v29 }
 0x197   : > { %v573_v32 = vmax.f32 %v550_v30, 0.0 }
 0x199   : > { %v583_v33 = vpack.c.bf16 %v573_v32, %v572_v31 }
 0x19b   : > { %687 = vmatmul.bf16.gmra.mxu2 %v583_v33 }
 0x1ce   : > { %v663_v35 = vpop.f32.mrf.mxu2 }
 0x1cf   : > { %v664_v36 = vadd.f32 %v997_v34, %v663_v35 }
 0x1d1   : > { %703 = vst [vmem:[%s1276_s20] sm:$0xff] %v664_v36 }
 0x1d6   : > { %v665_v37 = vpop.f32.mrf.mxu2 }
 0x1d7   : > { %v666_v38 = vadd.f32 %v997_v34, %v665_v37 }
 0x1d9   : > { %704 = vst [vmem:[%s1276_s20 + $0x8] sm:$0xff] %v666_v38 }
 0x1da   : > { %v693_v39 = vpop.f32.mrf.mxu3 }
 0x1db   : > { %v694_v40 = vadd.f32 %v997_v34, %v693_v39 }
 0x1dd   : > { %715 = vst [vmem:[%s1276_s20 + $0x60] sm:$0xff] %v694_v40 }
 0x1de   : > { %v668_v41 = vpop.f32.mrf.mxu2 }
 0x1df   : > { %v669_v42 = vadd.f32 %v997_v34, %v668_v41 }
 0x1e1   : > { %705 = vst [vmem:[%s1276_s20 + $0x10] sm:$0xff] %v669_v42 }
 0x1e2   : > { %v695_v43 = vpop.f32.mrf.mxu3 }
 0x1e3   : > { %v696_v44 = vadd.f32 %v997_v34, %v695_v43 }
 0x1e5   : > { %716 = vst [vmem:[%s1276_s20 + $0x68] sm:$0xff] %v696_v44 }
 0x1e6   : > { %v670_v45 = vpop.f32.mrf.mxu2 }
 0x1e7   : > { %v671_v46 = vadd.f32 %v997_v34, %v670_v45 }
 0x1e9   : > { %706 = vst [vmem:[%s1276_s20 + $0x18] sm:$0xff] %v671_v46 }
 0x1ea   : > { %v698_v47 = vpop.f32.mrf.mxu3 }
 0x1eb   : > { %v699_v48 = vadd.f32 %v997_v34, %v698_v47 }
 0x1ed   : > { %717 = vst [vmem:[%s1276_s20 + $0x70] sm:$0xff] %v699_v48 }
 0x1ee   : > { %v673_v49 = vpop.f32.mrf.mxu2 }
 0x1ef   : > { %v674_v50 = vadd.f32 %v997_v34, %v673_v49 }
 0x1f1   : > { %707 = vst [vmem:[%s1276_s20 + $0x20] sm:$0xff] %v674_v50 }
 0x1f2   : > { %v700_v51 = vpop.f32.mrf.mxu3 }
 0x1f3   : > { %v701_v52 = vadd.f32 %v997_v34, %v700_v51 }
 0x1f5   : > { %718 = vst [vmem:[%s1276_s20 + $0x78] sm:$0xff] %v701_v52 }
 0x1f6   : > { %v675_v53 = vpop.f32.mrf.mxu2 }
 0x1f7   : > { %v676_v54 = vadd.f32 %v997_v34, %v675_v53 }
 0x1f9   : > { %708 = vst [vmem:[%s1276_s20 + $0x28] sm:$0xff] %v676_v54 }
 0x1fe   : > { %v678_v55 = vpop.f32.mrf.mxu2 }
 0x1ff   : > { %v679_v56 = vadd.f32 %v997_v34, %v678_v55 }
 0x201   : > { %709 = vst [vmem:[%s1276_s20 + $0x30] sm:$0xff] %v679_v56 }
 0x206   : > { %v680_v57 = vpop.f32.mrf.mxu2 }
 0x207   : > { %v681_v58 = vadd.f32 %v997_v34, %v680_v57 }
 0x209   : > { %710 = vst [vmem:[%s1276_s20 + $0x38] sm:$0xff] %v681_v58 }
 0x20e   : > { %v683_v59 = vpop.f32.mrf.mxu2 }
 0x20f   : > { %v684_v60 = vadd.f32 %v997_v34, %v683_v59 }
 0x211   : > { %711 = vst [vmem:[%s1276_s20 + $0x40] sm:$0xff] %v684_v60 }
 0x216   : > { %v685_v61 = vpop.f32.mrf.mxu2 }
 0x217   : > { %v686_v62 = vadd.f32 %v997_v34, %v685_v61 }
 0x219   : > { %712 = vst [vmem:[%s1276_s20 + $0x48] sm:$0xff] %v686_v62 }
 0x21e   : > { %v688_v63 = vpop.f32.mrf.mxu2 }
 0x21f   : > { %v689_v0 = vadd.f32 %v997_v34, %v688_v63 }
 0x221   : > { %713 = vst [vmem:[%s1276_s20 + $0x50] sm:$0xff] %v689_v0 }
 0x226   : > { %v690_v1 = vpop.f32.mrf.mxu2 }
 0x227   : > { %v691_v2 = vadd.f32 %v997_v34, %v690_v1 }
 0x229   : > { %714 = vst [vmem:[%s1276_s20 + $0x58] sm:$0xff] %v691_v2 }
 0x22a   : > { %1025 = shalt.err (!%p1022_p3)
}
 0x22b   : > { %s1062_s14 = smov 128   ;;  %s1063_s20 = smov 8  }
 0x22c   : > { %954 = dma.vmem_to_hbm [thread:$0]  (%p1142_p5), %s733_s23, 2048, %s735_s29, %s720_s8, %s1062_s14, %s1062_s14, %s1063_s20  }
 0x22d PF: > { %p960_p4 = scmp.ge.s32.totalorder %s1060_s27, 2  ;;  %s749_s17 = sand.u32 1, %s1048_s24  }
 0x22e   : > { %s750_s21 = scalar_lea.sflag [#allocation3], %s749_s17 }
 0x22f   : > { %p957_p7 = pnand %p960_p4, %p1146_p6 }
 0x231   : > { %p958_p8 = pneg %p957_p7 }
 0x233   : > { %1043 = dma.done.wait (%p958_p8), %s750_s21, 2048  }
 0x234   : > { %1045 = vsyncadd (%p958_p8), %s750_s21, 4294965248  ;;  %p17_p9 = scmp.ge.s32.totalorder %s1129_s30, 4   ;;  %s1338_s24 = smov %s1052_s25 }
 0x235   : > { %s1339_s25 = smov %s1056_s26  ;;  %s1340_s26 = smov %s1140_s10 }
 0x236   : > { %s1341_s27 = smov %s1129_s30  ;;  %19 = sbr.rel (!%p17_p9) target bundleno = 3 (0x3), region = 83 }
 0x23b   :  { %756 = vsyncpa [#allocation3], 1 }
 0x23c   :  { %758 = vsyncpa [#allocation3 + $0x1], 1 }

</bundles_post_ra>
